<compile_context>
chip_gen: v7x
topology: tpu7x:2x2x1
jax: 0.10.0
libtpu: 0.0.40
codegen_flags: <defaults>
</compile_context>

<pallas_src>
import functools

import jax
import jax.numpy as jnp
from jax.experimental import pallas as pl
from jax.experimental.pallas import tpu as pltpu


def _layernorm2d_kernel(x_ref, w_ref, b_ref, o_ref, *, eps, inv_c):
    # x_ref: (C, T_HW) in I/O dtype; w_ref, b_ref: (C, 1) f32.
    # Each lane column is independent (reduction over C sublanes only), so any
    # garbage in out-of-bounds columns of a partial tile stays in those columns
    # and is dropped by the masked store.
    x = x_ref[...].astype(jnp.float32)                      # (C, T_HW)
    u = jnp.sum(x, axis=0, keepdims=True) * inv_c           # mean over C
    xc = x - u
    var = jnp.sum(xc * xc, axis=0, keepdims=True) * inv_c   # centered 2nd moment
    inv = jax.lax.rsqrt(var + eps)
    o_ref[...] = (w_ref[...] * (xc * inv) + b_ref[...]).astype(o_ref.dtype)


def _round_up(v, m):
    return (v + m - 1) // m * m


_VMEM_LIMIT_BYTES = 48 * 1024 * 1024   # headroom under v7x 64 MiB/TC; fine on 128 MiB parts
_TILE_BUDGET_BYTES = 28 * 1024 * 1024  # pipelined I/O tiles + f32 temporaries


def _pick_tile_hw(C, HW, itemsize):
    """Pick a lane-dense spatial tile size (multiple of 128).

    Per lane-column VMEM cost: 2x double-buffered input tiles + 2x output
    tiles in the I/O dtype (4*C*itemsize) plus ~2-3 f32 working copies of the
    tile inside the kernel (~12*C bytes). Budgeted against the explicit
    vmem_limit_bytes above so the large, roofline-friendly tile is kept on
    every generation without spilling.
    """
    per_lane = C * (4 * itemsize + 12)
    max_lanes = max(128, (_TILE_BUDGET_BYTES // per_lane) // 128 * 128)
    t = min(max_lanes, _round_up(HW, 128), 16384)
    return max(128, t)


def layernorm2d(x, weight, bias, eps=1e-6):
    """x: (N, C, H, W); weight, bias: (C,). Returns (N, C, H, W) in x.dtype."""
    N, C, H, W = x.shape
    HW = H * W
    itemsize = jnp.dtype(x.dtype).itemsize

    t_hw = _pick_tile_hw(C, HW, itemsize)
    n_hw_tiles = pl.cdiv(HW, t_hw)   # partial last tile handled by Pallas masking

    x3 = x.reshape(N, C, HW)
    w2 = weight.reshape(C, 1).astype(jnp.float32)
    b2 = bias.reshape(C, 1).astype(jnp.float32)

    kernel = functools.partial(
        _layernorm2d_kernel, eps=float(eps), inv_c=1.0 / float(C)
    )

    cost = pl.CostEstimate(
        flops=9 * N * C * HW,
        transcendentals=N * HW,
        bytes_accessed=2 * N * C * HW * itemsize + 2 * C * 4,
    )

    out = pl.pallas_call(
        kernel,
        out_shape=jax.ShapeDtypeStruct((N, C, HW), x.dtype),
        grid_spec=pltpu.PrefetchScalarGridSpec(
            num_scalar_prefetch=0,
            grid=(n_hw_tiles, N),
            in_specs=[
                pl.BlockSpec((pl.Squeezed(), C, t_hw), lambda s, n: (n, 0, s)),
                pl.BlockSpec((C, 1), lambda s, n: (0, 0)),
                pl.BlockSpec((C, 1), lambda s, n: (0, 0)),
            ],
            out_specs=pl.BlockSpec((pl.Squeezed(), C, t_hw), lambda s, n: (n, 0, s)),
        ),
        compiler_params=pltpu.CompilerParams(
            dimension_semantics=("parallel", "parallel"),
            vmem_limit_bytes=_VMEM_LIMIT_BYTES,
        ),
        cost_estimate=cost,
    )(x3, w2, b2)

    return out.reshape(N, C, H, W)


def _reference(x, weight, bias, eps):
    u = jnp.mean(x, axis=1, keepdims=True)
    s = jnp.mean((x - u) ** 2, axis=1, keepdims=True)
    y = (x - u) / jnp.sqrt(s + eps)
    return weight[None, :, None, None] * y + bias[None, :, None, None]


if __name__ == "__main__":
    key = jax.random.PRNGKey(0)
    N, C, H, W = 2, 4, 16, 16
    k0, k1, k2 = jax.random.split(key, 3)
    x = jax.random.normal(k0, (N, C, H, W), dtype=jnp.float32)

    # Parameters matching nn.Parameter(torch.ones/zeros(C)), perturbed so the
    # scale/shift path is actually exercised.
    weight = jnp.ones((C,), dtype=jnp.float32) + 0.1 * jax.random.normal(k1, (C,))
    bias = jnp.zeros((C,), dtype=jnp.float32) + 0.1 * jax.random.normal(k2, (C,))

    out = layernorm2d(x, weight, bias, eps=1e-6)
    out = jax.block_until_ready(out)
    ref = _reference(x, weight, bias, 1e-6)
    assert jnp.allclose(out, ref, atol=1e-5, rtol=1e-5), "mismatch vs reference"

    # Secondary check: HW not a multiple of 128 -> exercises the masked
    # partial-tile path (no wrapper padding anymore).
    x2 = jax.random.normal(jax.random.PRNGKey(1), (1, C, 10, 10), dtype=jnp.float32)
    out2 = jax.block_until_ready(layernorm2d(x2, weight, bias, eps=1e-6))
    ref2 = _reference(x2, weight, bias, 1e-6)
    assert jnp.allclose(out2, ref2, atol=1e-5, rtol=1e-5), "mismatch (partial tile)"

    print("KERNEL_OK")
</pallas_src>

<mosaic_0001>
module attributes {stable_mosaic.version = 11 : i64} {
  func.func @_layernorm2d_kernel(%arg0: i32, %arg1: i32, %arg2: memref<1x4x256xf32, #tpu.memory_space<vmem>>, %arg3: memref<4x1xf32, #tpu.memory_space<vmem>>, %arg4: memref<4x1xf32, #tpu.memory_space<vmem>>, %arg5: memref<1x4x256xf32, #tpu.memory_space<vmem>>) attributes {dimension_semantics = [#tpu.dimension_semantics<parallel>, #tpu.dimension_semantics<parallel>], iteration_bounds = array<i64: 1, 2>, scalar_prefetch = 0 : i64, scratch_operands = 0 : i64, tpu.core_type = #tpu.core_type<tc>, window_params = [{transform_indices = @transform_0, window_bounds = array<i64: 1, 4, 256>}, {pipeline_mode = #tpu.pipeline_mode<synchronous>, transform_indices = @transform_1, window_bounds = array<i64: 4, 1>}, {pipeline_mode = #tpu.pipeline_mode<synchronous>, transform_indices = @transform_2, window_bounds = array<i64: 4, 1>}, {transform_indices = @transform_3, window_bounds = array<i64: 1, 4, 256>}]} {
    %c0 = arith.constant 0 : index
    %c0_0 = arith.constant 0 : index
    %c0_1 = arith.constant 0 : index
    %0 = vector.load %arg2[%c0, %c0_0, %c0_1] : memref<1x4x256xf32, #tpu.memory_space<vmem>>, vector<1x4x256xf32>
    %1 = vector.shape_cast %0 : vector<1x4x256xf32> to vector<4x256xf32>
    %cst = arith.constant dense<0.000000e+00> : vector<256xf32>
    %2 = vector.multi_reduction <add>, %1, %cst [0] : vector<4x256xf32> to vector<256xf32>
    %3 = vector.shape_cast %2 : vector<256xf32> to vector<1x256xf32>
    %cst_2 = arith.constant 2.500000e-01 : f32
    %4 = vector.broadcast %cst_2 : f32 to vector<1x256xf32>
    %5 = arith.mulf %3, %4 : vector<1x256xf32>
    %6 = vector.broadcast %5 : vector<1x256xf32> to vector<4x256xf32>
    %7 = arith.subf %1, %6 : vector<4x256xf32>
    %8 = arith.mulf %7, %7 : vector<4x256xf32>
    %cst_3 = arith.constant dense<0.000000e+00> : vector<256xf32>
    %9 = vector.multi_reduction <add>, %8, %cst_3 [0] : vector<4x256xf32> to vector<256xf32>
    %10 = vector.shape_cast %9 : vector<256xf32> to vector<1x256xf32>
    %cst_4 = arith.constant 2.500000e-01 : f32
    %11 = vector.broadcast %cst_4 : f32 to vector<1x256xf32>
    %12 = arith.mulf %10, %11 : vector<1x256xf32>
    %cst_5 = arith.constant 9.99999997E-7 : f32
    %13 = vector.broadcast %cst_5 : f32 to vector<1x256xf32>
    %14 = arith.addf %12, %13 : vector<1x256xf32>
    %15 = math.rsqrt %14 : vector<1x256xf32>
    %c0_6 = arith.constant 0 : index
    %c0_7 = arith.constant 0 : index
    %16 = vector.load %arg3[%c0_6, %c0_7] : memref<4x1xf32, #tpu.memory_space<vmem>>, vector<4x1xf32>
    %17 = vector.broadcast %15 : vector<1x256xf32> to vector<4x256xf32>
    %18 = arith.mulf %7, %17 : vector<4x256xf32>
    %19 = vector.broadcast %16 : vector<4x1xf32> to vector<4x256xf32>
    %20 = arith.mulf %19, %18 : vector<4x256xf32>
    %c0_8 = arith.constant 0 : index
    %c0_9 = arith.constant 0 : index
    %21 = vector.load %arg4[%c0_8, %c0_9] : memref<4x1xf32, #tpu.memory_space<vmem>>, vector<4x1xf32>
    %22 = vector.broadcast %21 : vector<4x1xf32> to vector<4x256xf32>
    %23 = arith.addf %20, %22 : vector<4x256xf32>
    %c0_10 = arith.constant 0 : index
    %c0_11 = arith.constant 0 : index
    %c0_12 = arith.constant 0 : index
    %24 = vector.load %arg5[%c0_10, %c0_11, %c0_12] : memref<1x4x256xf32, #tpu.memory_space<vmem>>, vector<1x4x256xf32>
    %25 = vector.shape_cast %24 : vector<1x4x256xf32> to vector<4x256xf32>
    %26 = vector.shape_cast %23 : vector<4x256xf32> to vector<1x4x256xf32>
    tpu.vector_store %arg5[%c0_10, %c0_11, %c0_12], %26 {strides = array<i32>} : memref<1x4x256xf32, #tpu.memory_space<vmem>>, vector<1x4x256xf32>,
    return
  }
  func.func @transform_0(%arg0: i32, %arg1: i32) -> (i32, i32, i32) {
    %c0_i32 = arith.constant 0 : i32
    %c0_i32_0 = arith.constant 0 : i32
    return %arg1, %c0_i32, %arg0 : i32, i32, i32
  }
  func.func @transform_1(%arg0: i32, %arg1: i32) -> (i32, i32) {
    %c0_i32 = arith.constant 0 : i32
    %c0_i32_0 = arith.constant 0 : i32
    %c0_i32_1 = arith.constant 0 : i32
    return %c0_i32, %c0_i32_0 : i32, i32
  }
  func.func @transform_2(%arg0: i32, %arg1: i32) -> (i32, i32) {
    %c0_i32 = arith.constant 0 : i32
    %c0_i32_0 = arith.constant 0 : i32
    %c0_i32_1 = arith.constant 0 : i32
    return %c0_i32, %c0_i32_0 : i32, i32
  }
  func.func @transform_3(%arg0: i32, %arg1: i32) -> (i32, i32, i32) {
    %c0_i32 = arith.constant 0 : i32
    %c0_i32_0 = arith.constant 0 : i32
    return %arg1, %c0_i32, %arg0 : i32, i32, i32
  }
}

</mosaic_0001>

<bundles_post_ra>
// kernel: tpu_custom_call.1
= control target key start
LH: loop header
LB: loop body
LE: loop exit
PB: predicated region body
PF: predicated region fallthrough
CT: control target
= control target key end

     0   :  { %8 = vsyncpa [#allocation3], 0  ;;  %s796_s0 = inlined_call_operand.hbm [shape: f32[2,4,256], index: 0, kind: input, shape index: {}]   ;;  %s797_s1 = inlined_call_operand.vmem [shape: f32[4,1], index: 1, kind: input, shape index: {}]   ;;  %s798_s2 = inlined_call_operand.vmem [shape: f32[4,1], index: 2, kind: input, shape index: {}]   ;;  %s799_s3 = inlined_call_operand.hbm [shape: f32[2,4,256], index: 3, kind: output, shape index: {}]  }
   0x1   :  { %10 = vsyncpa [#allocation3 + $0x1], 0 }
   0x2   :  { %11 = vsyncpa [#allocation4], 0 }
   0x3   :  { %13 = vsyncpa [#allocation4 + $0x1], 0  ;;  %s610_s12 = smov 0   ;;  %s612_s13 = smov 0  }
   0x4   :  { %s614_s14 = smov 0   ;;  %s616_s15 = smov 0  }
   0x5   :  { %s618_s16 = smov 0   ;;  %s620_s17 = smov 0  }
   0x6 LB: > { %s387_s18 = sadd.s32 4294967295, %s585_s17   ;;  %s388_s19 = sadd.s32 4294967294, %s585_s17   ;;  %s585_s17 = sphi %s620_s17, %s19_s17   ;;  %s581_s16 = sphi %s618_s16, %s815_s16   ;;  %s577_s15 = sphi %s616_s15, %s814_s15   ;;  %s573_s14 = sphi %s614_s14, %s813_s14   ;;  %s569_s13 = sphi %s612_s13, %s812_s13   ;;  %s565_s12 = sphi %s610_s12, %s811_s12  }
   0x7   : > { %s28_s20 = sadd.s32 1, %s581_s16  ;;  %s40_s21 = sadd.s32 1, %s573_s14 }
   0x8   : > { %p29_p0 = scmp.ge.s32.totalorder %s28_s20, 2  ;;  %p47_p1 = scmp.ne.s32.totalorder %s573_s14, %s569_s13 }
   0x9   : > { %p48_p2 = scmp.eq.s32.totalorder %s585_s17, 0  ;;  %p53_p3 = scmp.ne.s32.totalorder %s569_s13, %s565_s12 }
   0xa   : > { %s817_s20 = smov (%p29_p0, %s28_s20), 0  ;;  %p54_p5 = scmp.eq.s32.totalorder %s387_s18, 0 }
   0xb   : > { %p651_p4 = por %p48_p2, %p47_p1  ;;  %s35_s23 = ssub.s32 %s581_s16, %s817_s20 }
   0xc   : > { %p121_p6 = scmp.eq.s32.totalorder %s387_s18, 1  ;;  %p38_p7 = scmp.eq.s32.totalorder %s35_s23, 0 }
   0xd   : > { %p657_p8 = por %p54_p5, %p53_p3  ;;  %p127_p10 = scmp.eq.s32.totalorder %s388_s19, 1 }
   0xe   : > { %p661_p9 = por %p121_p6, %p47_p1  ;;  %p416_p13 = scmp.lt.s32.totalorder %s585_s17, 2 }
   0xf   : > { %s666_s26 = scalar_select %p38_p7, %s573_s14, %s40_s21  }
  0x10   : > { %s803_s25 = scalar_select %p661_p9, 1, 0 }
  0x11   : > { %p668_p11 = por %p127_p10, %p53_p3  ;;  %s153_s28 = sand.u32 1, %s573_s14  }
  0x12   : > { %s391_s29 = sshll.u32 %s153_s28, 3  ;;  %s402_s30 = sshll.u32 %s581_s16, 7 }
  0x13   : > { %s804_s27 = scalar_select %p668_p11, 1, 0 }
  0x14   : > { %s679_s6 = scalar_lea.hbm %s796_s0, %s402_s30  ;;  %s157_s7 = scalar_lea.vmem [#allocation2], %s391_s29 }
  0x15   : > { %s167_s8 = sshll.u32 %s157_s7, 4  ;;  %p685_p0 = pnand %p416_p13, %p651_p4  ;;  %s681_s8 = int_to_ptr.vmem [resolvable:$true] %s167_s8 }
  0x16   : > { %s154_s10 = scalar_lea.sflag [#allocation3], %s153_s28  ;;  %s473_s11 = scalar_lea.hbm %s679_s6, 128 }
  0x17   : > { %p474_p3 = scmp.ne.s32.totalorder %s679_s6, %s473_s11  ;;  %p475_p5 = pneg %p685_p0 }
  0x18   : > { %s478_s21 = scalar_lea.hbm %s796_s0, 256  ;;  %p479_p4 = scmp.lt.u32.totalorder %s679_s6, %s796_s0 }
  0x19   : > { %p476_p6 = pnand %p475_p5, %p474_p3  ;;  %p480_p10 = scmp.lt.u32.totalorder %s478_s21, %s473_s11 }
  0x1a   : > { %p482_p12 = scmp.lt.u32.totalorder %s473_s11, %s679_s6 }
  0x1b   : > { %p477_p7 = pneg %p476_p6  ;;  %p481_p13 = por %p480_p10, %p479_p4 }
  0x1d   : > { %p483_p1 = por %p482_p12, %p481_p13 }
  0x1f   : > { %p484_p2 = pnand %p483_p1, %p477_p7 }
  0x21   : > { %487 = shalt.err (!%p484_p2)
}
  0x22   : > { %s488_s28 = scalar_lea.vmem %s681_s8, 128  ;;  %s587_s29 = smov [#allocation2]  }
  0x23   : > { %p489_p3 = scmp.ne.s32.totalorder %s681_s8, %s488_s28  ;;  %s493_s30 = sshll.u32 %s587_s29, 4  ;;  %s494_s30 = int_to_ptr.vmem [resolvable:$false] %s493_s30 }
  0x24   : > { %s495_s4 = scalar_lea.vmem %s494_s30, 256  ;;  %p496_p9 = scmp.lt.s32.totalorder %s681_s8, %s494_s30 }
  0x25   : > { %p491_p6 = pnand %p489_p3, %p475_p5  ;;  %p497_p4 = scmp.lt.s32.totalorder %s495_s4, %s488_s28 }
  0x27   : > { %p492_p11 = pneg %p491_p6  ;;  %p498_p10 = por %p497_p4, %p496_p9 }
  0x29   : > { %p499_p12 = pnand %p498_p10, %p492_p11 }
  0x2b   : > { %502 = shalt.err (!%p499_p12)
}
  0x2c   : > { %411 = dma.hbm_to_vmem [thread:$0]  (!%p685_p0), %s679_s6, 128, %s681_s8, %s154_s10  }
  0x2d   : > { %p806_p1 = scmp.lt.s32.totalorder %s585_s17, 3  ;;  %p807_p2 = scmp.ge.s32.totalorder %s585_s17, 1 }
  0x2f   : > { %p173_p5 = pnand %p807_p2, %p806_p1 }
  0x30   : > { %s721_s5 = sand.u32 (!%p173_p5), 1, %s569_s13  }
  0x31   : > { %176 = sbr.rel (%p173_p5) target bundleno = 209 (0xd1), region = 32  ;;  %s395_s7 = sshll.u32 (!%p173_p5), %s721_s5, 3 }
  0x32   : > { %s179_s11 = scalar_lea.sflag (!%p173_p5), [#allocation3], %s721_s5  ;;  %s182_s9 = scalar_lea.vmem (!%p173_p5), [#allocation2], %s395_s7 }
  0x38   : > { %556 = dma.done.wait (%p657_p8), %s179_s11, 128  }
  0x39   : > { %558 = vsyncadd (%p657_p8), %s179_s11, 4294967168  ;;  %v588_v0 = vmov 0   ;;  %v257_v1 = vld [vmem:[%s797_s1] sm:$0xf]  ;;  %vm211_vm0 = vcmask 1043456   ;;  %s403_s24 = sshll.u32 %s577_s15, 7 }
  0x3a   : > { %467 = vset.pattern.permute.xlu0 %v588_v0  ;;  %v273_v2 = vld [vmem:[%s798_s2] sm:$0xf]  ;;  %s204_s19 = scalar_lea.vmem [#allocation5], %s395_s7  ;;  %s747_s28 = scalar_lea.hbm %s799_s3, %s403_s24 }
  0x3b   : > { %265 = vperm.xlu0 %467, %v257_v1   ;;  %v207_v3 = vld [vmem:[%s182_s9] sm:$0xff]  ;;  %s303_s21 = sshll.u32 %s204_s19, 4  ;;  %s287_s29 = scalar_lea.sflag [#allocation4], %s721_s5  ;;  %s749_s21 = int_to_ptr.vmem [resolvable:$true] %s303_s21 }
  0x3c   : > { %v209_v4 = vcombine.high %v207_v3, %v207_v3  ;;  %v212_v5 = vsel %vm211_vm0, %v207_v3, 0.0  ;;  %s503_s30 = scalar_lea.vmem %s749_s21, 128  ;;  %p808_p9 = scmp.ne.s32.totalorder %s803_s25, 0 }
  0x3d   : > { %v213_v7 = vrot.slane %v212_v5, 4  ;;  %p504_p8 = scmp.ne.s32.totalorder %s749_s21, %s503_s30  ;;  %s589_s15 = smov [#allocation5]  }
  0x3e   : > { %v219_v6 = vsel %vm211_vm0, %v209_v4, 0.0  ;;  %s507_s4 = sshll.u32 %s589_s15, 4  ;;  %s508_s4 = int_to_ptr.vmem [resolvable:$false] %s507_s4 }
  0x3f   : > { %276 = vperm.xlu0 %467, %v273_v2   ;;  %v220_v8 = vrot.slane %v219_v6, 4  ;;  %v214_v9 = vadd.f32 %v213_v7, %v212_v5  ;;  %p505_p11 = pnand %p504_p8, %p808_p9  ;;  %s509_s7 = scalar_lea.vmem %s508_s4, 256 }
  0x40   : > { %p510_p7 = scmp.lt.s32.totalorder %s749_s21, %s508_s4  ;;  %p511_p13 = scmp.lt.s32.totalorder %s509_s7, %s503_s30 }
  0x41   : > { %v221_v10 = vadd.f32 %v220_v8, %v219_v6  ;;  %v215_v11 = vrot.slane %v214_v9, 2  ;;  %p506_p0 = pneg %p505_p11 }
  0x42   : > { %p512_p3 = por %p511_p13, %p510_p7 }
  0x43   : > { %v222_v12 = vrot.slane %v221_v10, 2  ;;  %v216_v13 = vadd.f32 %v215_v11, %v214_v9 }
  0x44   : > { %p513_p6 = pnand %p512_p3, %p506_p0 }
  0x45   : > { %v223_v14 = vadd.f32 %v222_v12, %v221_v10  ;;  %v217_v15 = vrot.slane %v216_v13, 1 }
  0x47   : > { %v224_v16 = vrot.slane %v223_v14, 1  ;;  %v218_v17 = vadd.f32 %v217_v15, %v216_v13 }
  0x49   : > { %v225_v18 = vadd.f32 %v224_v16, %v223_v14  ;;  %v226_v19 = vmul.f32 0.25, %v218_v17 }
  0x4b   : > { %v227_v20 = vmul.f32 0.25, %v225_v18 }
  0x4d   : > { %v230_v21 = vcombine.low %v226_v19, %v227_v20 }
  0x4f   : > { %v232_v22 = vsub.f32 %v207_v3, %v230_v21 }
  0x51   : > { %v233_v23 = vmul.f32 %v232_v22, %v232_v22 }
  0x53   : > { %v235_v24 = vcombine.high %v233_v23, %v233_v23  ;;  %v237_v25 = vsel %vm211_vm0, %v233_v23, 0.0 }
  0x54   : > { %v238_v27 = vrot.slane %v237_v25, 4 }
  0x55   : > { %v244_v26 = vsel %vm211_vm0, %v235_v24, 0.0 }
  0x56   : > { %v245_v28 = vrot.slane %v244_v26, 4  ;;  %v239_v29 = vadd.f32 %v238_v27, %v237_v25 }
  0x58   : > { %v246_v30 = vadd.f32 %v245_v28, %v244_v26  ;;  %v240_v31 = vrot.slane %v239_v29, 2 }
  0x5a   : > { %v247_v32 = vrot.slane %v246_v30, 2  ;;  %v241_v33 = vadd.f32 %v240_v31, %v239_v29 }
  0x5c   : > { %v248_v34 = vadd.f32 %v247_v32, %v246_v30  ;;  %v242_v35 = vrot.slane %v241_v33, 1 }
  0x5e   : > { %v249_v36 = vrot.slane %v248_v34, 1  ;;  %v243_v37 = vadd.f32 %v242_v35, %v241_v33 }
  0x60   : > { %v250_v38 = vadd.f32 %v249_v36, %v248_v34  ;;  %v251_v39 = vmul.f32 0.25, %v243_v37 }
  0x62   : > { %v252_v40 = vmul.f32 0.25, %v250_v38  ;;  %v253_v41 = vadd.f32 1e-06, %v251_v39 }
  0x64   : > { %v254_v42 = vadd.f32 1e-06, %v252_v40  ;;  %469 = vrsqrt.f32 %v253_v41 }
  0x66   : > { %471 = vrsqrt.f32 %v254_v42 }
  0x6e   : > { %v470_v43 = vpop.eup %469 }
  0x70   : > { %v472_v44 = vpop.eup %471 }
  0x71   : > { %v260_v45 = vcombine.low %v470_v43, %v472_v44 }
  0x73   : > { %v262_v46 = vmul.f32 %v260_v45, %v232_v22 }
  0x75   : > { %v269_v47 = vcombine.high %v262_v46, %v262_v46 }
  0xba   : > { %v266_v48 = vpop.permute.xlu0 %265 }
  0xbb   : > { %v271_v49 = vmul.f32 %v266_v48, %v262_v46  ;;  %v272_v50 = vmul.f32 %v269_v47, %v266_v48 }
  0xbe   : > { %v277_v51 = vpop.permute.xlu0 %276 }
  0xbf   : > { %v279_v52 = vadd.f32 %v277_v51, %v271_v49  ;;  %v280_v53 = vadd.f32 %v277_v51, %v272_v50 }
  0xc1   : > { %v283_v54 = vcombine.low %v279_v52, %v280_v53 }
  0xc3   : > { %285 = vst [vmem:[%s204_s19] sm:$0xff] %v283_v54 }
  0xc4   : > { %516 = shalt.err (!%p513_p6)
}
  0xc5   : > { %s517_s5 = scalar_lea.hbm %s747_s28, 128  ;;  %s521_s6 = scalar_lea.hbm %s799_s3, 256 }
  0xc6   : > { %p518_p4 = scmp.ne.s32.totalorder %s747_s28, %s517_s5  ;;  %p522_p1 = scmp.lt.u32.totalorder %s747_s28, %s799_s3 }
  0xc7   : > { %p523_p2 = scmp.lt.u32.totalorder %s521_s6, %s517_s5  ;;  %p525_p8 = scmp.lt.u32.totalorder %s517_s5, %s747_s28 }
  0xc8   : > { %p519_p10 = pnand %p518_p4, %p808_p9 }
  0xc9   : > { %p524_p5 = por %p523_p2, %p522_p1 }
  0xca   : > { %p520_p12 = pneg %p519_p10 }
  0xcb   : > { %p526_p11 = por %p525_p8, %p524_p5 }
  0xcd   : > { %p527_p0 = pnand %p526_p11, %p520_p12 }
  0xcf   : > { %530 = shalt.err (!%p527_p0)
}
  0xd0   : > { %406 = dma.vmem_to_hbm [thread:$0]  (%p808_p9), %s749_s21, 128, %s747_s28, %s287_s29  }
  0xd1 PF: > { %s315_s18 = sand.u32 1, %s565_s12   ;;  %p809_p7 = scmp.ne.s32.totalorder %s804_s27, 0 }
  0xd2   : > { %p810_p13 = scmp.ge.s32.totalorder %s585_s17, 2  ;;  %s316_s24 = scalar_lea.sflag [#allocation4], %s315_s18 }
  0xd4   : > { %p413_p3 = pnand %p810_p13, %p809_p7 }
  0xd6   : > { %560 = dma.done.wait (!%p413_p3), %s316_s24, 128  }
  0xd7   : > { %562 = vsyncadd (!%p413_p3), %s316_s24, 4294967168  ;;  %s19_s17 = sadd.s32 1, %s585_s17   ;;  %s811_s12 = smov %s569_s13 }
  0xd8   : > { %p16_p6 = scmp.ge.s32.totalorder %s19_s17, 4   ;;  %s812_s13 = smov %s573_s14 }
  0xd9   : > { %s813_s14 = smov %s666_s26  ;;  %s814_s15 = smov %s581_s16 }
  0xda   : > { %s815_s16 = smov %s817_s20  ;;  %18 = sbr.rel (!%p16_p6) target bundleno = 6 (0x6), region = 77 }
  0xe1   :  { %321 = vsyncpa [#allocation3], 1 }
  0xe2   :  { %323 = vsyncpa [#allocation3 + $0x1], 1 }
  0xe3   :  { %324 = vsyncpa [#allocation4], 1 }
  0xe4   :  { %326 = vsyncpa [#allocation4 + $0x1], 1 }

</bundles_post_ra>
